<compile_context>
chip_gen: v6e
topology: v6e:2x2x1
jax: 0.10.0
libtpu: 0.0.40
codegen_flags: <defaults>
</compile_context>

<pallas_src>
import functools

import jax
import jax.numpy as jnp
from jax.experimental import pallas as pl
from jax.experimental.pallas import tpu as pltpu


def _round_up(n, m):
    return ((n + m - 1) // m) * m


def _sra_kernel(x_ref, w_ref, b_ref, g_ref, out_ref):
    # Fused encoder: one bf16 matmul on the MXU, f32 accumulate, f32 bias add.
    z = jnp.dot(x_ref[...], w_ref[...],
                preferred_element_type=jnp.float32) + b_ref[...]
    # sigmoid via tanh: single EUP push + one VPU fma (cheaper than exp+divide).
    o = 0.5 * jnp.tanh(0.5 * z) + 0.5
    # q == k (same encoder, same input, dropout=0, eval): qk = enc(x)^2.
    qk = (o * o).astype(g_ref.dtype)
    # Head-sum with d_k**-0.5 folded into G (block-diagonal, lane-padded so the
    # output block is a full multiple of 128 lanes -> unmasked vst).
    out_ref[...] = jnp.dot(qk, g_ref[...], preferred_element_type=jnp.float32)


def self_reinforcement_attention(x, params, dim_input, dim_head):
    """x: (B, dim_input) float32 -> att: (B, dim_input) float32."""
    B, P = x.shape
    assert P == dim_input
    w1, b1, w2, b2, w3, b3 = params
    d_inner = dim_input * dim_head
    scale = float(dim_head) ** -0.5

    # ---- Parameter prep (outside the kernel; constant-folded under jit) -----
    # No nonlinearity between L1/L2/L3 -> collapse to one affine map.
    w_eff = (w1 @ w2) @ w3                    # (dim_input, d_inner), f32
    b_eff = (b1 @ w2 + b2) @ w3 + b3          # (1, d_inner),        f32

    # Group-sum matrix with the scale folded in; columns padded to a multiple
    # of 128 so the kernel writes full lanes (wrapper slices off the padding).
    p_pad = _round_up(dim_input, 128)
    g = jnp.where(
        (jnp.arange(d_inner)[:, None] // dim_head) == jnp.arange(p_pad)[None, :],
        jnp.float32(scale), jnp.float32(0.0))

    # bf16 MXU operands, f32 accumulation inside the kernel.
    x_bf = x.astype(jnp.bfloat16)
    w_bf = w_eff.astype(jnp.bfloat16)
    g_bf = g.astype(jnp.bfloat16)

    # ---- Tiling --------------------------------------------------------------
    # Largest batch tile (multiple of 8) up to 1024 rows; per-step VMEM stays
    # small (x tile + f32 out tile << 1 MiB double-buffered). Large B gets
    # several grid steps, sharded across TensorCores on v7x via "parallel".
    bm = min(1024, _round_up(B, 8))
    grid = (pl.cdiv(B, bm),)

    def resident(arr):
        # Weight / bias / G: same block at every grid step (stays resident).
        return pl.BlockSpec(arr.shape, lambda i: (0, 0))

    out_padded = pl.pallas_call(
        _sra_kernel,
        out_shape=jax.ShapeDtypeStruct((B, p_pad), jnp.float32),
        grid=grid,
        in_specs=[
            pl.BlockSpec((bm, dim_input), lambda i: (i, 0)),   # x tile
            resident(w_bf),                                    # fused weight
            resident(b_eff),                                   # fused bias (f32)
            resident(g_bf),                                    # scaled group-sum
        ],
        out_specs=pl.BlockSpec((bm, p_pad), lambda i: (i, 0)),
        compiler_params=pltpu.CompilerParams(
            dimension_semantics=("parallel",),
            vmem_limit_bytes=32 * 1024 * 1024),
    )(x_bf, w_bf, b_eff, g_bf)

    if p_pad == dim_input:
        return out_padded
    return out_padded[:, :dim_input]


def init_params(key, dim_input, dim_head):
    """Deterministic init mirroring nn.Linear (uniform +/- 1/sqrt(fan_in)).
    Weights stored as (in_features, out_features) = PyTorch weight.T."""
    d_inner = dim_input * dim_head
    d1 = d_inner // 4
    d2 = d_inner // 2
    dims = [(dim_input, d1), (d1, d2), (d2, d_inner)]
    params = []
    for (fan_in, fan_out) in dims:
        key, kw, kb = jax.random.split(key, 3)
        bound = 1.0 / (fan_in ** 0.5)
        w = jax.random.uniform(kw, (fan_in, fan_out), jnp.float32, -bound, bound)
        b = jax.random.uniform(kb, (1, fan_out), jnp.float32, -bound, bound)
        params += [w, b]
    return tuple(params)


def _reference(x, params, dim_input, dim_head):
    """Unfused f32 reference matching the PyTorch forward (eval mode)."""
    w1, b1, w2, b2, w3, b3 = params
    h = x @ w1 + b1
    h = h @ w2 + b2
    o = jax.nn.sigmoid(h @ w3 + b3)
    o = o.reshape(x.shape[0], dim_input, dim_head)
    return (o * o * (dim_head ** -0.5)).sum(-1)


if __name__ == "__main__":
    dim_input = 16
    dim_head = 8
    batch = 8

    key = jax.random.PRNGKey(0)
    key, kx, kp = jax.random.split(key, 3)
    x = jax.random.normal(kx, (batch, dim_input), jnp.float32)
    params = init_params(kp, dim_input, dim_head)

    sra = jax.jit(functools.partial(self_reinforcement_attention,
                                    dim_input=dim_input, dim_head=dim_head))
    att = jax.block_until_ready(sra(x, params))

    ref = _reference(x, params, dim_input, dim_head)
    assert att.shape == (batch, dim_input)
    # bf16 MXU operands + fused affine reassociation -> small abs error budget.
    assert jnp.allclose(att, ref, atol=2e-2, rtol=2e-2), "mismatch vs reference"

    print("KERNEL_OK")
</pallas_src>

<mosaic_0001>
module attributes {stable_mosaic.version = 11 : i64} {
  func.func @_sra_kernel(%arg0: i32, %arg1: memref<8x16xbf16, #tpu.memory_space<vmem>>, %arg2: memref<16x128xbf16, #tpu.memory_space<vmem>>, %arg3: memref<1x128xf32, #tpu.memory_space<vmem>>, %arg4: memref<128x128xbf16, #tpu.memory_space<vmem>>, %arg5: memref<8x128xf32, #tpu.memory_space<vmem>>) attributes {dimension_semantics = [#tpu.dimension_semantics<parallel>], iteration_bounds = array<i64: 1>, scalar_prefetch = 0 : i64, scratch_operands = 0 : i64, tpu.core_type = #tpu.core_type<tc>, window_params = [{transform_indices = @transform_0, window_bounds = array<i64: 8, 16>}, {pipeline_mode = #tpu.pipeline_mode<synchronous>, transform_indices = @transform_1, window_bounds = array<i64: 16, 128>}, {pipeline_mode = #tpu.pipeline_mode<synchronous>, transform_indices = @transform_2, window_bounds = array<i64: 1, 128>}, {pipeline_mode = #tpu.pipeline_mode<synchronous>, transform_indices = @transform_3, window_bounds = array<i64: 128, 128>}, {transform_indices = @transform_4, window_bounds = array<i64: 8, 128>}]} {
    %c0 = arith.constant 0 : index
    %c0_0 = arith.constant 0 : index
    %0 = vector.load %arg1[%c0, %c0_0] : memref<8x16xbf16, #tpu.memory_space<vmem>>, vector<8x16xbf16>
    %c0_1 = arith.constant 0 : index
    %c0_2 = arith.constant 0 : index
    %1 = vector.load %arg2[%c0_1, %c0_2] : memref<16x128xbf16, #tpu.memory_space<vmem>>, vector<16x128xbf16>
    %cst = arith.constant dense<0.000000e+00> : vector<8x128xf32>
    %2 = tpu.matmul %0, %1, %cst {dimension_numbers = #tpu.dot_dimension_numbers<[1], [0], [0], [1], [0, 0, 1, 1], [], []>} : vector<8x16xbf16>, vector<16x128xbf16>, vector<8x128xf32> -> vector<8x128xf32>
    %c0_3 = arith.constant 0 : index
    %c0_4 = arith.constant 0 : index
    %3 = vector.load %arg3[%c0_3, %c0_4] : memref<1x128xf32, #tpu.memory_space<vmem>>, vector<1x128xf32>
    %4 = vector.broadcast %3 : vector<1x128xf32> to vector<8x128xf32>
    %5 = arith.addf %2, %4 : vector<8x128xf32>
    %cst_5 = arith.constant 5.000000e-01 : f32
    %6 = vector.broadcast %cst_5 : f32 to vector<8x128xf32>
    %7 = arith.mulf %6, %5 : vector<8x128xf32>
    %8 = math.tanh %7 : vector<8x128xf32>
    %cst_6 = arith.constant 5.000000e-01 : f32
    %9 = vector.broadcast %cst_6 : f32 to vector<8x128xf32>
    %10 = arith.mulf %9, %8 : vector<8x128xf32>
    %cst_7 = arith.constant 5.000000e-01 : f32
    %11 = vector.broadcast %cst_7 : f32 to vector<8x128xf32>
    %12 = arith.addf %10, %11 : vector<8x128xf32>
    %13 = arith.mulf %12, %12 : vector<8x128xf32>
    %14 = arith.truncf %13 : vector<8x128xf32> to vector<8x128xbf16>
    %c0_8 = arith.constant 0 : index
    %c0_9 = arith.constant 0 : index
    %15 = vector.load %arg4[%c0_8, %c0_9] : memref<128x128xbf16, #tpu.memory_space<vmem>>, vector<128x128xbf16>
    %cst_10 = arith.constant dense<0.000000e+00> : vector<8x128xf32>
    %16 = tpu.matmul %14, %15, %cst_10 {dimension_numbers = #tpu.dot_dimension_numbers<[1], [0], [0], [1], [0, 0, 1, 1], [], []>} : vector<8x128xbf16>, vector<128x128xbf16>, vector<8x128xf32> -> vector<8x128xf32>
    %c0_11 = arith.constant 0 : index
    %c0_12 = arith.constant 0 : index
    %17 = vector.load %arg5[%c0_11, %c0_12] : memref<8x128xf32, #tpu.memory_space<vmem>>, vector<8x128xf32>
    tpu.vector_store %arg5[%c0_11, %c0_12], %16 {strides = array<i32>} : memref<8x128xf32, #tpu.memory_space<vmem>>, vector<8x128xf32>,
    return
  }
  func.func @transform_0(%arg0: i32) -> (i32, i32) {
    %c0_i32 = arith.constant 0 : i32
    %c0_i32_0 = arith.constant 0 : i32
    return %arg0, %c0_i32 : i32, i32
  }
  func.func @transform_1(%arg0: i32) -> (i32, i32) {
    %c0_i32 = arith.constant 0 : i32
    %c0_i32_0 = arith.constant 0 : i32
    %c0_i32_1 = arith.constant 0 : i32
    return %c0_i32, %c0_i32_0 : i32, i32
  }
  func.func @transform_2(%arg0: i32) -> (i32, i32) {
    %c0_i32 = arith.constant 0 : i32
    %c0_i32_0 = arith.constant 0 : i32
    %c0_i32_1 = arith.constant 0 : i32
    return %c0_i32, %c0_i32_0 : i32, i32
  }
  func.func @transform_3(%arg0: i32) -> (i32, i32) {
    %c0_i32 = arith.constant 0 : i32
    %c0_i32_0 = arith.constant 0 : i32
    %c0_i32_1 = arith.constant 0 : i32
    return %c0_i32, %c0_i32_0 : i32, i32
  }
  func.func @transform_4(%arg0: i32) -> (i32, i32) {
    %c0_i32 = arith.constant 0 : i32
    %c0_i32_0 = arith.constant 0 : i32
    return %arg0, %c0_i32 : i32, i32
  }
}

</mosaic_0001>

<bundles_post_ra>
// kernel: self_reinforcement_attention.1
= control target key start
LH: loop header
LB: loop body
LE: loop exit
PB: predicated region body
PF: predicated region fallthrough
CT: control target
= control target key end

     0   :  { %v288_v1 = vmov 0.0   ;;  %vm289_vm0 = vmmov 0   ;;  %vm35_vm1 = vcmask 130048   ;;  %s352_s0 = inlined_call_operand.vmem [shape: bf16[8,16], index: 0, kind: input, shape index: {}]   ;;  %s353_s1 = inlined_call_operand.vmem [shape: bf16[16,128], index: 1, kind: input, shape index: {}]   ;;  %s354_s2 = inlined_call_operand.vmem [shape: f32[1,128], index: 2, kind: input, shape index: {}]   ;;  %s355_s3 = inlined_call_operand.vmem [shape: bf16[128,128], index: 3, kind: input, shape index: {}]   ;;  %s356_s4 = inlined_call_operand.hbm [shape: f32[8,128], index: 4, kind: output, shape index: {}]  }
   0x1   :  { %v255_v0 = vld [vmem:[%s353_s1] sm:$0xff]   ;;  %226 = vmatprep.subr.bf16.mxu0 %v288_v1  ;;  %232 = vmatprep.subr.bf16.mxu1 %v288_v1  ;;  %v256_v3 = vld [vmem:[%s355_s3 + $0x38] sm:$0xff]  }
   0x2   :  { %227 = vmatpush3.bf16.msra.mxu0 %v255_v0  ;;  %228 = vmatprep.mubr.msk.bf16.mxu0 %vm289_vm0, %v288_v1  ;;  %v19_v2 = vld [vmem:[%s352_s0] sm:$0xf] }
   0x3   :  { %248 = vmatprep.mubr.msk.bf16.mxu1 %vm289_vm0, %v288_v1  ;;  %233 = vmatpush3.bf16.msra.mxu1 %v256_v3 }
   0x4   :  { %234 = vmatprep.subr.bf16.mxu1 %v288_v1 }
   0x5   :  { %229 = vmatmul.mubr.msk.bf16.vlgmr.msra.gmra.mxu0 %vm35_vm1, %v19_v2 }
   0x6   :  { %9 = vsyncpa [#allocation3], 0  ;;  %v257_v4 = vld [vmem:[%s355_s3 + $0x30] sm:$0xff]   ;;  %v258_v5 = vld [vmem:[%s355_s3 + $0x28] sm:$0xff]  }
   0x7   :  { %235 = vmatpush3.bf16.msra.mxu1 %v257_v4  ;;  %v259_v6 = vld [vmem:[%s355_s3 + $0x20] sm:$0xff]   ;;  %v260_v7 = vld [vmem:[%s355_s3 + $0x18] sm:$0xff]   ;;  %v261_v8 = vld [vmem:[%s355_s3 + $0x10] sm:$0xff]  }
   0x8   :  { %236 = vmatprep.subr.bf16.mxu1 %v288_v1  ;;  %v262_v9 = vld [vmem:[%s355_s3 + $0x8] sm:$0xff]   ;;  %v263_v10 = vld [vmem:[%s355_s3] sm:$0xff]   ;;  %s290_s3 = smov [#allocation2]  }
   0x9   :  { %v204_v11 = vld [vmem:[%s354_s2] ss:$0 sm:$0xff]  ;;  %s196_s9 = sshll.u32 %s290_s3, 4  ;;  %s197_s9 = int_to_ptr.vmem [resolvable:$true] %s196_s9 }
   0xa   :  { %s266_s2 = scalar_lea.vmem %s197_s9, 128  ;;  %p271_p1 = scmp.lt.s32.totalorder %s197_s9, %s197_s9 }
   0xb   :  { %237 = vmatpush3.bf16.msra.mxu1 %v258_v5  ;;  %p267_p0 = scmp.ne.s32.totalorder %s197_s9, %s266_s2  ;;  %p272_p2 = scmp.lt.s32.totalorder %s266_s2, %s266_s2 }
   0xc   :  { %238 = vmatprep.subr.bf16.mxu1 %v288_v1 }
   0xd   :  { %p273_p3 = por %p272_p2, %p271_p1 }
   0xf   :  { %239 = vmatpush3.bf16.msra.mxu1 %v259_v6  ;;  %p274_p4 = pnand %p273_p3, %p267_p0 }
  0x10   :  { %240 = vmatprep.subr.bf16.mxu1 %v288_v1 }
  0x13   :  { %241 = vmatpush3.bf16.msra.mxu1 %v260_v7 }
  0x14   :  { %242 = vmatprep.subr.bf16.mxu1 %v288_v1 }
  0x17   :  { %243 = vmatpush3.bf16.msra.mxu1 %v261_v8 }
  0x18   :  { %244 = vmatprep.subr.bf16.mxu1 %v288_v1 }
  0x1b   :  { %245 = vmatpush3.bf16.msra.mxu1 %v262_v9 }
  0x1c   :  { %246 = vmatprep.subr.bf16.mxu1 %v288_v1 }
  0x1f   :  { %247 = vmatpush3.bf16.msra.mxu1 %v263_v10 }
  0xc5   :  { %v73_v12 = vpop.f32.mrf.mxu0 }
  0xc6   :  { %v74_v13 = vadd.f32 %v204_v11, %v73_v12 }
  0xc7   :  { %v230_v14 = vpop.f32.mrf.mxu0 }
  0xc8   :  { %v79_v15 = vmul.f32 0.5, %v74_v13 }
  0xc9   :  { %v76_v16 = vpop.f32.mrf.mxu0 }
  0xca   :  { %264 = vtanh.f32 %v79_v15 }
  0xcb   :  { %v231_v17 = vpop.f32.mrf.mxu0 }
  0xd7   :  { %v265_v18 = vpop.eup %264 }
  0xd8   :  { %v81_v19 = vmul.f32 0.5, %v265_v18 }
  0xda   :  { %v82_v20 = vadd.f32 0.5, %v81_v19 }
  0xdc   :  { %v83_v21 = vmul.f32 %v82_v20, %v82_v20 }
  0xde   :  { %v84_v22 = vpack.c.bf16 %v83_v21, %v83_v21 }
  0xe0   :  { %249 = vmatmul.mubr.bf16.vlgmr.msra.gmra.mxu1 %v84_v22 }
 0x1a0   :  { %v183_v23 = vpop.f32.mrf.mxu1 }
 0x1a1   :  { %189 = vst [vmem:[#allocation2] sm:$0xff] %v183_v23 }
 0x1a2   :  { %v250_v24 = vpop.f32.mrf.mxu1 }
 0x1a3   :  { %277 = shalt.err (!%p274_p4)
}
 0x1a4   :  { %199 = dma.vmem_to_hbm [thread:$0]  %s197_s9, 128, %s356_s4, [#allocation3]   ;;  %v186_v25 = vpop.f32.mrf.mxu1 }
 0x1a6   :  { %v251_v26 = vpop.f32.mrf.mxu1 }
 0x1a7   :  { %286 = dma.done.wait [#allocation3], 128  }
 0x1a8   :  { %287 = vsyncadd [#allocation3], 4294967168 }
 0x1a9   :  { %203 = vsyncpa [#allocation3], 1 }

</bundles_post_ra>
